<compile_context>
chip_gen: v7x
topology: tpu7x:2x2x1
jax: 0.10.0
libtpu: 0.0.40
codegen_flags: <defaults>
</compile_context>

<pallas_src>
import functools

import jax
import jax.numpy as jnp
from jax.experimental import pallas as pl
from jax.experimental.pallas import tpu as pltpu


def masked_conv_kernel(x_ref, p_ref, o_ref, *, N, H, Wp, KH, KW, Cin, Cout):
    """Whole-batch masked 3x3 conv as one MXU matmul.

    x_ref: (N, Cin, Lp)        zero-padded NCHW input, spatial flattened
    p_ref: (Cout, K + 2)       [weights (tap-major kh,kw,ci) | bias | mask]
    o_ref: (N, Cout, H*Wp)     masked conv output on the padded-width grid
    """
    HWp = H * Wp
    K = KH * KW * Cin

    w = p_ref[:, :K]                      # (Cout, K)
    b = p_ref[:, K:K + 1]                 # (Cout, 1)
    m = p_ref[:, K + 1:K + 2]             # (Cout, 1)
    bm = b * m                            # fused bias*mask term

    # Assemble the (K, N*HWp) im2col operand as a register value: for each of
    # the 9 taps, take a static lane-offset slice of every image's flattened
    # padded input and lay the images side by side along lanes (offsets are
    # multiples of HWp = 384, i.e. 128-aligned).
    taps = []
    for kh in range(KH):
        for kw in range(KW):
            d = kh * Wp + kw
            parts = [x_ref[n, :, d:d + HWp] for n in range(N)]   # (Cin, HWp) each
            taps.append(jnp.concatenate(parts, axis=-1))          # (Cin, N*HWp)
    patches = jnp.concatenate(taps, axis=0)                       # (K, N*HWp)

    # One MXU matmul for the whole batch; f32 accumulation.
    acc = jnp.dot(w, patches, preferred_element_type=jnp.float32)  # (Cout, N*HWp)

    # Fused epilogue: (conv + bias) * mask, then lane-dense per-image stores
    # at 128-aligned lane offsets.
    out = acc * m + bm
    for n in range(N):
        o_ref[n] = out[:, n * HWp:(n + 1) * HWp].astype(o_ref.dtype)


def masked_layer_forward(x_nchw, weight, bias, mask, *, padding=1):
    """MaskedLayer.forward for base=Conv2d(stride=1, 3x3, pad=1)."""
    N, Cin, H, W = x_nchw.shape
    Cout, Cin_w, KH, KW = weight.shape
    assert Cin == Cin_w
    assert padding == 1 and (KH, KW) == (3, 3)

    # Padded-width pitch: at least W + 2*padding for the conv reads, rounded up
    # so that H*Wp is a multiple of 128 (lane-dense stores, 128-aligned per-
    # image lane offsets). Extra columns are zero-padded and sliced off below.
    lane = 128
    Wp = W + 2 * padding
    while (H * Wp) % lane:
        Wp += 1

    Hpad = H + 2 * padding + 1            # +1 extra zero row so tap slices never run OOB
    HWp = H * Wp
    Lp = Hpad * Wp
    K = KH * KW * Cin
    assert (KH - 1) * Wp + (KW - 1) + HWp <= Lp

    # Wrapper glue: zero-pad spatially, then metadata-only reshape flattening
    # spatial into the lane axis. No transposes of x.
    x_pad = jnp.pad(x_nchw, ((0, 0), (0, 0),
                             (padding, Hpad - H - padding),
                             (padding, Wp - W - padding)))
    x_flat = x_pad.reshape(N, Cin, Lp)

    # Single parameter slab: OIHW -> (co, kh, kw, ci) -> (Cout, K), tap-major,
    # with bias and mask appended as two extra columns (one DMA instead of 3).
    w2d = jnp.transpose(weight, (0, 2, 3, 1)).reshape(Cout, K)
    p2d = jnp.concatenate(
        [w2d, bias.reshape(Cout, 1).astype(w2d.dtype),
         mask.reshape(Cout, 1).astype(w2d.dtype)], axis=1)        # (Cout, K+2)

    kern = functools.partial(masked_conv_kernel, N=N, H=H, Wp=Wp,
                             KH=KH, KW=KW, Cin=Cin, Cout=Cout)

    out_flat = pl.pallas_call(
        kern,
        out_shape=jax.ShapeDtypeStruct((N, Cout, HWp), x_nchw.dtype),
        grid=(1,),
        in_specs=[
            pl.BlockSpec((N, Cin, Lp), lambda i: (0, 0, 0)),
            pl.BlockSpec((Cout, K + 2), lambda i: (0, 0)),
        ],
        out_specs=pl.BlockSpec((N, Cout, HWp), lambda i: (0, 0, 0)),
        compiler_params=pltpu.CompilerParams(
            dimension_semantics=("arbitrary",)),
    )(x_flat, p2d)

    # (N, Cout, H*Wp) is NCHW on the padded-width grid: metadata reshape, then
    # drop the padded garbage columns to get NCHW (PyTorch convention).
    return out_flat.reshape(N, Cout, H, Wp)[:, :, :, :W]


def _reference(x_nchw, weight, bias, mask):
    y = jax.lax.conv_general_dilated(
        x_nchw, weight, window_strides=(1, 1), padding=((1, 1), (1, 1)),
        dimension_numbers=("NCHW", "OIHW", "NCHW"),
        precision=jax.lax.Precision.HIGHEST)
    y = y + bias.reshape(1, -1, 1, 1)
    return y * mask.reshape(1, -1, 1, 1)


if __name__ == "__main__":
    N, Cin, H, W = 2, 4, 16, 16
    Cout, KH, KW = 8, 3, 3

    key = jax.random.PRNGKey(0)
    kx, kw, kb = jax.random.split(key, 3)

    x = jax.random.normal(kx, (N, Cin, H, W), dtype=jnp.float32)
    weight = jax.random.normal(kw, (Cout, Cin, KH, KW), dtype=jnp.float32) * 0.1
    bias = jax.random.normal(kb, (Cout,), dtype=jnp.float32) * 0.1
    # Fine-pruning mask: zero out every 3rd output channel.
    mask = (jnp.arange(Cout) % 3 != 0).astype(jnp.float32)

    out = masked_layer_forward(x, weight, bias, mask)
    out = jax.block_until_ready(out)

    ref = _reference(x, weight, bias, mask)
    assert out.shape == (N, Cout, H, W)
    assert jnp.max(jnp.abs(out - ref)) < 1e-4, "mismatch vs reference conv"

    print("KERNEL_OK")
</pallas_src>

<mosaic_0001>
module attributes {stable_mosaic.version = 11 : i64} {
  func.func @masked_conv_kernel(%arg0: i32, %arg1: memref<2x4x456xf32, #tpu.memory_space<vmem>>, %arg2: memref<8x38xf32, #tpu.memory_space<vmem>>, %arg3: memref<2x8x384xf32, #tpu.memory_space<vmem>>) attributes {dimension_semantics = [#tpu.dimension_semantics<arbitrary>], iteration_bounds = array<i64: 1>, scalar_prefetch = 0 : i64, scratch_operands = 0 : i64, tpu.core_type = #tpu.core_type<tc>, window_params = [{pipeline_mode = #tpu.pipeline_mode<synchronous>, transform_indices = @transform_0, window_bounds = array<i64: 2, 4, 456>}, {pipeline_mode = #tpu.pipeline_mode<synchronous>, transform_indices = @transform_1, window_bounds = array<i64: 8, 38>}, {pipeline_mode = #tpu.pipeline_mode<synchronous>, transform_indices = @transform_2, window_bounds = array<i64: 2, 8, 384>}]} {
    %c0 = arith.constant 0 : index
    %c0_0 = arith.constant 0 : index
    %0 = vector.load %arg2[%c0, %c0_0] : memref<8x38xf32, #tpu.memory_space<vmem>>, vector<8x36xf32>
    %c0_1 = arith.constant 0 : index
    %c36 = arith.constant 36 : index
    %1 = vector.load %arg2[%c0_1, %c36] : memref<8x38xf32, #tpu.memory_space<vmem>>, vector<8x1xf32>
    %c0_2 = arith.constant 0 : index
    %c37 = arith.constant 37 : index
    %2 = vector.load %arg2[%c0_2, %c37] : memref<8x38xf32, #tpu.memory_space<vmem>>, vector<8x1xf32>
    %3 = arith.mulf %1, %2 : vector<8x1xf32>
    %c0_3 = arith.constant 0 : index
    %c0_4 = arith.constant 0 : index
    %c0_5 = arith.constant 0 : index
    %4 = vector.load %arg1[%c0_3, %c0_4, %c0_5] : memref<2x4x456xf32, #tpu.memory_space<vmem>>, vector<1x4x384xf32>
    %5 = vector.shape_cast %4 : vector<1x4x384xf32> to vector<4x384xf32>
    %c1 = arith.constant 1 : index
    %c0_6 = arith.constant 0 : index
    %c0_7 = arith.constant 0 : index
    %6 = vector.load %arg1[%c1, %c0_6, %c0_7] : memref<2x4x456xf32, #tpu.memory_space<vmem>>, vector<1x4x384xf32>
    %7 = vector.shape_cast %6 : vector<1x4x384xf32> to vector<4x384xf32>
    %8 = tpu.concatenate %5, %7 in 1 : vector<4x384xf32>, vector<4x384xf32> -> vector<4x768xf32>
    %c0_8 = arith.constant 0 : index
    %c0_9 = arith.constant 0 : index
    %c1_10 = arith.constant 1 : index
    %9 = vector.load %arg1[%c0_8, %c0_9, %c1_10] : memref<2x4x456xf32, #tpu.memory_space<vmem>>, vector<1x4x384xf32>
    %10 = vector.shape_cast %9 : vector<1x4x384xf32> to vector<4x384xf32>
    %c1_11 = arith.constant 1 : index
    %c0_12 = arith.constant 0 : index
    %c1_13 = arith.constant 1 : index
    %11 = vector.load %arg1[%c1_11, %c0_12, %c1_13] : memref<2x4x456xf32, #tpu.memory_space<vmem>>, vector<1x4x384xf32>
    %12 = vector.shape_cast %11 : vector<1x4x384xf32> to vector<4x384xf32>
    %13 = tpu.concatenate %10, %12 in 1 : vector<4x384xf32>, vector<4x384xf32> -> vector<4x768xf32>
    %c0_14 = arith.constant 0 : index
    %c0_15 = arith.constant 0 : index
    %c2 = arith.constant 2 : index
    %14 = vector.load %arg1[%c0_14, %c0_15, %c2] : memref<2x4x456xf32, #tpu.memory_space<vmem>>, vector<1x4x384xf32>
    %15 = vector.shape_cast %14 : vector<1x4x384xf32> to vector<4x384xf32>
    %c1_16 = arith.constant 1 : index
    %c0_17 = arith.constant 0 : index
    %c2_18 = arith.constant 2 : index
    %16 = vector.load %arg1[%c1_16, %c0_17, %c2_18] : memref<2x4x456xf32, #tpu.memory_space<vmem>>, vector<1x4x384xf32>
    %17 = vector.shape_cast %16 : vector<1x4x384xf32> to vector<4x384xf32>
    %18 = tpu.concatenate %15, %17 in 1 : vector<4x384xf32>, vector<4x384xf32> -> vector<4x768xf32>
    %c0_19 = arith.constant 0 : index
    %c0_20 = arith.constant 0 : index
    %c24 = arith.constant 24 : index
    %19 = vector.load %arg1[%c0_19, %c0_20, %c24] : memref<2x4x456xf32, #tpu.memory_space<vmem>>, vector<1x4x384xf32>
    %20 = vector.shape_cast %19 : vector<1x4x384xf32> to vector<4x384xf32>
    %c1_21 = arith.constant 1 : index
    %c0_22 = arith.constant 0 : index
    %c24_23 = arith.constant 24 : index
    %21 = vector.load %arg1[%c1_21, %c0_22, %c24_23] : memref<2x4x456xf32, #tpu.memory_space<vmem>>, vector<1x4x384xf32>
    %22 = vector.shape_cast %21 : vector<1x4x384xf32> to vector<4x384xf32>
    %23 = tpu.concatenate %20, %22 in 1 : vector<4x384xf32>, vector<4x384xf32> -> vector<4x768xf32>
    %c0_24 = arith.constant 0 : index
    %c0_25 = arith.constant 0 : index
    %c25 = arith.constant 25 : index
    %24 = vector.load %arg1[%c0_24, %c0_25, %c25] : memref<2x4x456xf32, #tpu.memory_space<vmem>>, vector<1x4x384xf32>
    %25 = vector.shape_cast %24 : vector<1x4x384xf32> to vector<4x384xf32>
    %c1_26 = arith.constant 1 : index
    %c0_27 = arith.constant 0 : index
    %c25_28 = arith.constant 25 : index
    %26 = vector.load %arg1[%c1_26, %c0_27, %c25_28] : memref<2x4x456xf32, #tpu.memory_space<vmem>>, vector<1x4x384xf32>
    %27 = vector.shape_cast %26 : vector<1x4x384xf32> to vector<4x384xf32>
    %28 = tpu.concatenate %25, %27 in 1 : vector<4x384xf32>, vector<4x384xf32> -> vector<4x768xf32>
    %c0_29 = arith.constant 0 : index
    %c0_30 = arith.constant 0 : index
    %c26 = arith.constant 26 : index
    %29 = vector.load %arg1[%c0_29, %c0_30, %c26] : memref<2x4x456xf32, #tpu.memory_space<vmem>>, vector<1x4x384xf32>
    %30 = vector.shape_cast %29 : vector<1x4x384xf32> to vector<4x384xf32>
    %c1_31 = arith.constant 1 : index
    %c0_32 = arith.constant 0 : index
    %c26_33 = arith.constant 26 : index
    %31 = vector.load %arg1[%c1_31, %c0_32, %c26_33] : memref<2x4x456xf32, #tpu.memory_space<vmem>>, vector<1x4x384xf32>
    %32 = vector.shape_cast %31 : vector<1x4x384xf32> to vector<4x384xf32>
    %33 = tpu.concatenate %30, %32 in 1 : vector<4x384xf32>, vector<4x384xf32> -> vector<4x768xf32>
    %c0_34 = arith.constant 0 : index
    %c0_35 = arith.constant 0 : index
    %c48 = arith.constant 48 : index
    %34 = vector.load %arg1[%c0_34, %c0_35, %c48] : memref<2x4x456xf32, #tpu.memory_space<vmem>>, vector<1x4x384xf32>
    %35 = vector.shape_cast %34 : vector<1x4x384xf32> to vector<4x384xf32>
    %c1_36 = arith.constant 1 : index
    %c0_37 = arith.constant 0 : index
    %c48_38 = arith.constant 48 : index
    %36 = vector.load %arg1[%c1_36, %c0_37, %c48_38] : memref<2x4x456xf32, #tpu.memory_space<vmem>>, vector<1x4x384xf32>
    %37 = vector.shape_cast %36 : vector<1x4x384xf32> to vector<4x384xf32>
    %38 = tpu.concatenate %35, %37 in 1 : vector<4x384xf32>, vector<4x384xf32> -> vector<4x768xf32>
    %c0_39 = arith.constant 0 : index
    %c0_40 = arith.constant 0 : index
    %c49 = arith.constant 49 : index
    %39 = vector.load %arg1[%c0_39, %c0_40, %c49] : memref<2x4x456xf32, #tpu.memory_space<vmem>>, vector<1x4x384xf32>
    %40 = vector.shape_cast %39 : vector<1x4x384xf32> to vector<4x384xf32>
    %c1_41 = arith.constant 1 : index
    %c0_42 = arith.constant 0 : index
    %c49_43 = arith.constant 49 : index
    %41 = vector.load %arg1[%c1_41, %c0_42, %c49_43] : memref<2x4x456xf32, #tpu.memory_space<vmem>>, vector<1x4x384xf32>
    %42 = vector.shape_cast %41 : vector<1x4x384xf32> to vector<4x384xf32>
    %43 = tpu.concatenate %40, %42 in 1 : vector<4x384xf32>, vector<4x384xf32> -> vector<4x768xf32>
    %c0_44 = arith.constant 0 : index
    %c0_45 = arith.constant 0 : index
    %c50 = arith.constant 50 : index
    %44 = vector.load %arg1[%c0_44, %c0_45, %c50] : memref<2x4x456xf32, #tpu.memory_space<vmem>>, vector<1x4x384xf32>
    %45 = vector.shape_cast %44 : vector<1x4x384xf32> to vector<4x384xf32>
    %c1_46 = arith.constant 1 : index
    %c0_47 = arith.constant 0 : index
    %c50_48 = arith.constant 50 : index
    %46 = vector.load %arg1[%c1_46, %c0_47, %c50_48] : memref<2x4x456xf32, #tpu.memory_space<vmem>>, vector<1x4x384xf32>
    %47 = vector.shape_cast %46 : vector<1x4x384xf32> to vector<4x384xf32>
    %48 = tpu.concatenate %45, %47 in 1 : vector<4x384xf32>, vector<4x384xf32> -> vector<4x768xf32>
    %49 = tpu.concatenate %8, %13, %18, %23, %28, %33, %38, %43, %48 in 0 : vector<4x768xf32>, vector<4x768xf32>, vector<4x768xf32>, vector<4x768xf32>, vector<4x768xf32>, vector<4x768xf32>, vector<4x768xf32>, vector<4x768xf32>, vector<4x768xf32> -> vector<36x768xf32>
    %cst = arith.constant dense<0.000000e+00> : vector<8x768xf32>
    %50 = tpu.matmul %0, %49, %cst {dimension_numbers = #tpu.dot_dimension_numbers<[1], [0], [0], [1], [0, 0, 1, 1], [], []>} : vector<8x36xf32>, vector<36x768xf32>, vector<8x768xf32> -> vector<8x768xf32>
    %51 = vector.broadcast %2 : vector<8x1xf32> to vector<8x768xf32>
    %52 = arith.mulf %50, %51 : vector<8x768xf32>
    %53 = vector.broadcast %3 : vector<8x1xf32> to vector<8x768xf32>
    %54 = arith.addf %52, %53 : vector<8x768xf32>
    %55 = vector.extract_strided_slice %54 {offsets = [0, 0], sizes = [8, 384], strides = [1, 1]} : vector<8x768xf32> to vector<8x384xf32>
    %c0_49 = arith.constant 0 : index
    %c0_50 = arith.constant 0 : index
    %c0_51 = arith.constant 0 : index
    %56 = vector.load %arg3[%c0_49, %c0_50, %c0_51] : memref<2x8x384xf32, #tpu.memory_space<vmem>>, vector<1x8x384xf32>
    %57 = vector.shape_cast %56 : vector<1x8x384xf32> to vector<8x384xf32>
    %58 = vector.shape_cast %55 : vector<8x384xf32> to vector<1x8x384xf32>
    tpu.vector_store %arg3[%c0_49, %c0_50, %c0_51], %58 {strides = array<i32>} : memref<2x8x384xf32, #tpu.memory_space<vmem>>, vector<1x8x384xf32>,
    %59 = vector.extract_strided_slice %54 {offsets = [0, 384], sizes = [8, 384], strides = [1, 1]} : vector<8x768xf32> to vector<8x384xf32>
    %c1_52 = arith.constant 1 : index
    %c0_53 = arith.constant 0 : index
    %c0_54 = arith.constant 0 : index
    %60 = vector.load %arg3[%c1_52, %c0_53, %c0_54] : memref<2x8x384xf32, #tpu.memory_space<vmem>>, vector<1x8x384xf32>
    %61 = vector.shape_cast %60 : vector<1x8x384xf32> to vector<8x384xf32>
    %62 = vector.shape_cast %59 : vector<8x384xf32> to vector<1x8x384xf32>
    tpu.vector_store %arg3[%c1_52, %c0_53, %c0_54], %62 {strides = array<i32>} : memref<2x8x384xf32, #tpu.memory_space<vmem>>, vector<1x8x384xf32>,
    return
  }
  func.func @transform_0(%arg0: i32) -> (i32, i32, i32) {
    %c0_i32 = arith.constant 0 : i32
    %c0_i32_0 = arith.constant 0 : i32
    %c0_i32_1 = arith.constant 0 : i32
    %c0_i32_2 = arith.constant 0 : i32
    return %c0_i32, %c0_i32_0, %c0_i32_1 : i32, i32, i32
  }
  func.func @transform_1(%arg0: i32) -> (i32, i32) {
    %c0_i32 = arith.constant 0 : i32
    %c0_i32_0 = arith.constant 0 : i32
    %c0_i32_1 = arith.constant 0 : i32
    return %c0_i32, %c0_i32_0 : i32, i32
  }
  func.func @transform_2(%arg0: i32) -> (i32, i32, i32) {
    %c0_i32 = arith.constant 0 : i32
    %c0_i32_0 = arith.constant 0 : i32
    %c0_i32_1 = arith.constant 0 : i32
    %c0_i32_2 = arith.constant 0 : i32
    return %c0_i32, %c0_i32_0, %c0_i32_1 : i32, i32, i32
  }
}

</mosaic_0001>

<bundles_post_ra>
// kernel: tpu_custom_call.1
= control target key start
LH: loop header
LB: loop body
LE: loop exit
PB: predicated region body
PF: predicated region fallthrough
CT: control target
= control target key end

     0   :  { %7 = vsyncpa [#allocation3], 0  ;;  %s1173_s0 = inlined_call_operand.hbm [shape: f32[2,4,456], index: 0, kind: input, shape index: {}]   ;;  %s1174_s1 = inlined_call_operand.hbm [shape: f32[8,38], index: 1, kind: input, shape index: {}]   ;;  %s1175_s2 = inlined_call_operand.hbm [shape: f32[2,8,384], index: 2, kind: output, shape index: {}]  }
   0x1   :  { %8 = vsyncpa [#allocation6], 0 }
   0x2   :  { %9 = vsyncpa [#allocation4], 0  ;;  %s879_s9 = smov [#allocation2]   ;;  %s807_s13 = scalar_lea.hbm %s1173_s0, 512 }
   0x3   :  { %s15_s10 = sshll.u32 %s879_s9, 4  ;;  %p808_p0 = scmp.ne.s32.totalorder %s1173_s0, %s807_s13  ;;  %s16_s10 = int_to_ptr.vmem [resolvable:$true] %s15_s10 }
   0x4   :  { %p811_p1 = scmp.lt.u32.totalorder %s807_s13, %s1173_s0 }
   0x6   :  { %p813_p2 = pnand %p811_p1, %p808_p0 }
   0x8   :  { %816 = shalt.err (!%p813_p2)
}
   0x9   :  { %s817_s18 = scalar_lea.vmem %s16_s10, 512  ;;  %p822_p4 = scmp.lt.s32.totalorder %s16_s10, %s16_s10 }
   0xa   :  { %p818_p3 = scmp.ne.s32.totalorder %s16_s10, %s817_s18  ;;  %p823_p5 = scmp.lt.s32.totalorder %s817_s18, %s817_s18 }
   0xc   :  { %p824_p6 = por %p823_p5, %p822_p4 }
   0xe   :  { %p825_p7 = pnand %p824_p6, %p818_p3 }
  0x10   :  { %828 = shalt.err (!%p825_p7)
}
  0x11   :  { %s880_s19 = smov 256   ;;  %s881_s20 = smov 16  }
  0x12   :  { %21 = dma.hbm_to_vmem [thread:$0]  %s1173_s0, 512, %s16_s10, [#allocation3], %s880_s19, %s880_s19, %s881_s20  }
  0x13   :  { %s882_s23 = smov [#allocation5]   ;;  %s829_s27 = scalar_lea.hbm %s1174_s1, 128 }
  0x14   :  { %s28_s24 = sshll.u32 %s882_s23, 4  ;;  %p830_p8 = scmp.ne.s32.totalorder %s1174_s1, %s829_s27  ;;  %s29_s24 = int_to_ptr.vmem [resolvable:$true] %s28_s24 }
  0x15   :  { %p833_p9 = scmp.lt.u32.totalorder %s829_s27, %s1174_s1 }
  0x17   :  { %p835_p10 = pnand %p833_p9, %p830_p8 }
  0x19   :  { %838 = shalt.err (!%p835_p10)
}
  0x1a   :  { %s839_s4 = scalar_lea.vmem %s29_s24, 128  ;;  %p844_p12 = scmp.lt.s32.totalorder %s29_s24, %s29_s24 }
  0x1b   :  { %p840_p11 = scmp.ne.s32.totalorder %s29_s24, %s839_s4  ;;  %p845_p13 = scmp.lt.s32.totalorder %s839_s4, %s839_s4 }
  0x1d   :  { %p846_p0 = por %p845_p13, %p844_p12 }
  0x1f   :  { %p847_p1 = pnand %p846_p0, %p840_p11 }
  0x21   :  { %850 = shalt.err (!%p847_p1)
}
  0x22   :  { %31 = dma.hbm_to_vmem [thread:$0]  %s1174_s1, 128, %s29_s24, [#allocation6]  }
  0x23   :  { %873 = dma.done.wait [#allocation3], 512  }
  0x24   :  { %874 = vsyncadd [#allocation3], 4294966784 }
  0x25   :  { %875 = dma.done.wait [#allocation6], 128  }
  0x26   :  { %876 = vsyncadd [#allocation6], 4294967168  ;;  %v936_v0 = vld [vmem:[#allocation2] sm:$0xff]  ;;  %v938_v1 = vld [vmem:[#allocation2 + $0x10] sm:$0xff]  ;;  %s883_s6 = smov 127   ;;  %s884_s1 = smov 104  }
  0x27   :  { %v55_v2 = vld [vmem:[#allocation2 + $0x8] sm:$0xff]  ;;  %v661_v3 = vpack.i.bf16 %v938_v1, %v936_v0  ;;  %v944_v4 = vcombine.high %v936_v0, %v936_v0  ;;  %s885_s7 = smov 126   ;;  %s886_s8 = smov 79   ;;  %v56_v6 = vld [vmem:[#allocation2 + $0x18] sm:$0xff]  ;;  %v954_v9 = vcombine.high %v938_v1, %v938_v1  ;;  %v891_v12 = vmov 0.0   ;;  %v970_v15 = vld [vmem:[#allocation5] sm:$0xff] }
  0x28   :  { %s887_s9 = smov 102   ;;  %s888_s10 = smov 80   ;;  %v58_v7 = vcombine.high %v55_v2, %v55_v2  ;;  %v72_v8 = vcombine.high %v56_v6, %v56_v6  ;;  %415 = vmatprep.mubr.f32.mxu0 %v891_v12  ;;  %486 = vmatprep.mubr.f32.mxu1 %v891_v12  ;;  %v892_v13 = vmov 37   ;;  %v893_v14 = vmov 36  }
  0x29   :  { %662 = vrot.lane.b32.xlu1 %v661_v3, %s883_s6  ;;  %v676_v5 = vpack.i.bf16 %v55_v2, %v944_v4  ;;  %s889_s11 = smov 103   ;;  %v731_v11 = vpack.i.bf16 %v56_v6, %v954_v9  ;;  %s890_s12 = smov 78   ;;  %802 = vset.pattern.permute.xlu0 %v893_v14  ;;  %vm67_vm0 = vcmask 1039360   ;;  %vm121_vm1 = vcmask 850944  }
  0x2a   :  { %v736_v10 = vpack.i.bf16 %v58_v7, %v72_v8  ;;  %801 = vset.pattern.permute.xlu1 %v892_v13  ;;  %vm92_vm2 = vcmask 1031168   ;;  %vm311_vm3 = vcmask 1043456   ;;  %vm225_vm4 = vcmask 646144   ;;  %s894_s13 = smov [#allocation7]  }
  0x2b   :  { %677 = vrot.lane.b32.xlu0 %v676_v5, %s883_s6  ;;  %vm173_vm5 = vcmask 834560   ;;  %vm196_vm6 = vcmask 654336   ;;  %vm144_vm7 = vcmask 842752   ;;  %vm248_vm8 = vcmask 637952   ;;  %s597_s14 = sshll.u32 %s894_s13, 4  ;;  %s598_s14 = int_to_ptr.vmem [resolvable:$true] %s597_s14 }
  0x2c   :  { %vm336_vm9 = vcmask 293888   ;;  %s851_s15 = scalar_lea.vmem %s598_s14, 768  ;;  %p856_p3 = scmp.lt.s32.totalorder %s598_s14, %s598_s14 }
  0x2d   :  { %667 = vrot.lane.b32.xlu1 %v661_v3, %s884_s1  ;;  %p852_p2 = scmp.ne.s32.totalorder %s598_s14, %s851_s15  ;;  %p857_p4 = scmp.lt.s32.totalorder %s851_s15, %s851_s15 }
  0x2f   :  { %682 = vrot.lane.b32.xlu0 %v676_v5, %s884_s1  ;;  %p858_p5 = por %p857_p4, %p856_p3 }
  0x31   :  { %672 = vrot.lane.b32.xlu1 %v661_v3, %s885_s7  ;;  %p859_p6 = pnand %p858_p5, %p852_p2 }
  0x33   :  { %687 = vrot.lane.b32.xlu0 %v676_v5, %s885_s7 }
  0x35   :  { %697 = vrot.lane.b32.xlu1 %v676_v5, %s886_s8 }
  0x37   :  { %692 = vrot.lane.b32.xlu0 %v676_v5, %s887_s9 }
  0x39   :  { %707 = vrot.lane.b32.xlu1 %v661_v3, %s886_s8 }
  0x3b   :  { %702 = vrot.lane.b32.xlu0 %v661_v3, %s887_s9 }
  0x3d   :  { %717 = vrot.lane.b32.xlu1 %v676_v5, %s888_s10 }
  0x3f   :  { %712 = vrot.lane.b32.xlu0 %v676_v5, %s889_s11 }
  0x41   :  { %727 = vrot.lane.b32.xlu1 %v661_v3, %s888_s10 }
  0x43   :  { %722 = vrot.lane.b32.xlu0 %v661_v3, %s889_s11 }
  0x45   :  { %737 = vrot.lane.b32.xlu1 %v736_v10, %s883_s6 }
  0x47   :  { %732 = vrot.lane.b32.xlu0 %v731_v11, %s883_s6 }
  0x49   :  { %747 = vrot.lane.b32.xlu1 %v736_v10, %s884_s1 }
  0x4b   :  { %742 = vrot.lane.b32.xlu0 %v731_v11, %s884_s1 }
  0x4d   :  { %757 = vrot.lane.b32.xlu1 %v736_v10, %s885_s7 }
  0x4f   :  { %752 = vrot.lane.b32.xlu0 %v731_v11, %s885_s7 }
  0x51   :  { %244 = vrot.lane.b32.xlu1 %v55_v2, %s890_s12 }
  0x53   :  { %242 = vrot.lane.b32.xlu0 %v944_v4, %s890_s12 }
  0x55   :  { %767 = vrot.lane.b32.xlu1 %v736_v10, %s887_s9 }
  0x57   :  { %762 = vrot.lane.b32.xlu0 %v731_v11, %s887_s9 }
  0x59   :  { %777 = vrot.lane.b32.xlu1 %v736_v10, %s886_s8 }
  0x5b   :  { %772 = vrot.lane.b32.xlu0 %v731_v11, %s886_s8 }
  0x5d   :  { %782 = vrot.lane.b32.xlu1 %v731_v11, %s889_s11 }
  0x5f   :  { %240 = vrot.lane.b32.xlu0 %v936_v0, %s890_s12 }
  0x61   :  { %792 = vrot.lane.b32.xlu1 %v731_v11, %s888_s10 }
  0x63   :  { %787 = vrot.lane.b32.xlu0 %v736_v10, %s889_s11 }
  0x65   :  { %252 = vrot.lane.b32.xlu1 %v938_v1, %s890_s12 }
  0x67   :  { %797 = vrot.lane.b32.xlu0 %v736_v10, %s888_s10 }
  0x69   :  { %256 = vrot.lane.b32.xlu1 %v56_v6, %s890_s12 }
  0x6b   :  { %254 = vrot.lane.b32.xlu0 %v954_v9, %s890_s12 }
  0x6d   :  { %246 = vrot.lane.b32.xlu1 %v58_v7, %s890_s12 }
  0x6f   :  { %258 = vrot.lane.b32.xlu0 %v72_v8, %s890_s12 }
  0x71   :  { %565 = vperm.xlu1 %801, %v970_v15  }
  0x73   :  { %40 = vrot.lane.b32.xlu0 %v970_v15, %s883_s6 }
  0x9b   :  { %v975_v16 = vpop.permute.xlu1 %662 }
  0x9c   :  { %v664_v20 = vunpack.i.l.bf16 %v975_v16 }
  0x9d   :  { %v977_v17 = vpop.permute.xlu0 %677 }
  0x9e   :  { %v680_v18 = vunpack.i.h.bf16 %v977_v17  ;;  %v679_v19 = vunpack.i.l.bf16 %v977_v17 }
  0x9f   :  { %v982_v21 = vpop.permute.xlu1 %667 }
  0xa0   :  { %v669_v22 = vunpack.i.l.bf16 %v982_v21  ;;  %v69_v26 = vsel %vm67_vm0, %v679_v19, %v680_v18  ;;  %v68_v27 = vsel %vm67_vm0, %v664_v20, %v679_v19 }
  0xa1   :  { %v985_v23 = vpop.permute.xlu0 %682  ;;  %v264_v33 = vrot.slane %v69_v26, 4  ;;  %v263_v34 = vrot.slane %v68_v27, 4 }
  0xa2   :  { %v685_v24 = vunpack.i.h.bf16 %v985_v23  ;;  %v684_v25 = vunpack.i.l.bf16 %v985_v23  ;;  %v45_v23 = vld [vmem:[#allocation2 + $0x8] sm:$0xf] }
  0xa3   :  { %v993_v28 = vpop.permute.xlu1 %672  ;;  %v313_v43 = vsel %vm311_vm3, %v944_v4, %v264_v33  ;;  %v312_v48 = vsel %vm311_vm3, %v936_v0, %v263_v34 }
  0xa4   :  { %v122_v29 = vsel %vm121_vm1, %v669_v22, %v684_v25  ;;  %v674_v30 = vunpack.i.l.bf16 %v993_v28  ;;  %v123_v31 = vsel %vm121_vm1, %v684_v25, %v685_v24 }
  0xa5   :  { %v1000_v32 = vpop.permute.xlu0 %687  ;;  %v275_v37 = vrot.slane %v122_v29, 4  ;;  %v276_v39 = vrot.slane %v123_v31, 4 }
  0xa6   :  { %v690_v35 = vunpack.i.h.bf16 %v1000_v32  ;;  %v689_v36 = vunpack.i.l.bf16 %v1000_v32 }
  0xa7   :  { %v1004_v38 = vpop.permute.xlu1 %697 }
  0xa8   :  { %v94_v40 = vsel %vm92_vm2, %v689_v36, %v690_v35  ;;  %v93_v41 = vsel %vm92_vm2, %v674_v30, %v689_v36  ;;  %v700_v46 = vunpack.i.h.bf16 %v1004_v38  ;;  %v699_v49 = vunpack.i.l.bf16 %v1004_v38 }
  0xa9   :  { %v1010_v42 = vpop.permute.xlu0 %692  ;;  %v319_v44 = vsel %vm311_vm3, %v94_v40, %v276_v39  ;;  %v318_v45 = vsel %vm311_vm3, %v93_v41, %v275_v37  ;;  %v665_v40 = vunpack.i.h.bf16 %v975_v16  ;;  %v675_v16 = vunpack.i.h.bf16 %v993_v28 }
  0xaa   :  { %v619_v47 = vpack.c.bf16 %v319_v44, %v313_v43  ;;  %v695_v50 = vunpack.i.h.bf16 %v1010_v42  ;;  %v694_v51 = vunpack.i.l.bf16 %v1010_v42  ;;  %v621_v53 = vpack.c.bf16 %v318_v45, %v312_v48 }
  0xab   :  { %v1022_v52 = vpop.permute.xlu1 %707  ;;  %v227_v55 = vsel %vm225_vm4, %v699_v49, %v700_v46 }
  0xac   :  { %620 = vmatprep.subr.bf16.mxu0 %v619_v47  ;;  %v175_v56 = vsel %vm173_vm5, %v694_v51, %v695_v50  ;;  %v709_v58 = vunpack.i.l.bf16 %v1022_v52  ;;  %v300_v3 = vrot.slane %v227_v55, 4  ;;  %v670_v47 = vunpack.i.h.bf16 %v982_v21 }
  0xad   :  { %v1024_v54 = vpop.permute.xlu0 %702  ;;  %622 = vmatpush1.bf16.msra.mxu0 %v621_v53  ;;  %v288_v4 = vrot.slane %v175_v56, 4 }
  0xae   :  { %v704_v59 = vunpack.i.l.bf16 %v1024_v54  ;;  %v226_v6 = vsel %vm225_vm4, %v709_v58, %v699_v49 }
  0xaf   :  { %v1032_v57 = vpop.permute.xlu1 %717  ;;  %v299_v25 = vrot.slane %v226_v6, 4 }
  0xb0   :  { %v720_v60 = vunpack.i.h.bf16 %v1032_v57  ;;  %v719_v61 = vunpack.i.l.bf16 %v1032_v57  ;;  %v174_v7 = vsel %vm173_vm5, %v704_v59, %v694_v51 }
  0xb1   :  { %v1038_v62 = vpop.permute.xlu0 %712  ;;  %v287_v26 = vrot.slane %v174_v7, 4 }
  0xb2   :  { %v198_v63 = vsel %vm196_vm6, %v719_v61, %v720_v60  ;;  %v715_v0 = vunpack.i.h.bf16 %v1038_v62  ;;  %v714_v2 = vunpack.i.l.bf16 %v1038_v62 }
  0xb3   :  { %v1045_v5 = vpop.permute.xlu1 %727  ;;  %v331_v14 = vsel %vm311_vm3, %v198_v63, %v300_v3 }
  0xb4   :  { %v146_v8 = vsel %vm144_vm7, %v714_v2, %v715_v0  ;;  %v729_v10 = vunpack.i.l.bf16 %v1045_v5 }
  0xb5   :  { %v1053_v11 = vpop.permute.xlu0 %722  ;;  %v325_v13 = vsel %vm311_vm3, %v146_v8, %v288_v4 }
  0xb6   :  { %v197_v19 = vsel %vm196_vm6, %v729_v10, %v719_v61  ;;  %v724_v20 = vunpack.i.l.bf16 %v1053_v11  ;;  %v623_v22 = vpack.c.bf16 %v331_v14, %v325_v13 }
  0xb7   :  { %v738_v27 = vpop.permute.xlu1 %737  ;;  %v330_v33 = vsel %vm311_vm3, %v197_v19, %v299_v25 }
  0xb8   :  { %v145_v29 = vsel %vm144_vm7, %v724_v20, %v714_v2  ;;  %624 = vmatprep.subr.bf16.mxu0 %v623_v22  ;;  %v740_v37 = vunpack.i.h.bf16 %v738_v27 }
  0xb9   :  { %v733_v30 = vpop.permute.xlu0 %732  ;;  %v324_v31 = vsel %vm311_vm3, %v145_v29, %v287_v26 }
  0xba   :  { %v734_v34 = vunpack.i.l.bf16 %v733_v30  ;;  %v625_v36 = vpack.c.bf16 %v330_v33, %v324_v31  ;;  %v70_v48 = vsel %vm67_vm0, %v680_v18, %v740_v37  ;;  %v735_v2 = vunpack.i.h.bf16 %v733_v30 }
  0xbb   :  { %v748_v39 = vpop.permute.xlu1 %747  ;;  %v265_v59 = vrot.slane %v70_v48, 4 }
  0xbc   :  { %v750_v41 = vunpack.i.h.bf16 %v748_v39  ;;  %626 = vmatpush1.bf16.msra.mxu0 %v625_v36  ;;  %v81_v45 = vsel %vm67_vm0, %v665_v40, %v734_v34  ;;  %v749_v4 = vunpack.i.l.bf16 %v748_v39 }
  0xbd   :  { %v743_v43 = vpop.permute.xlu0 %742  ;;  %v266_v58 = vrot.slane %v81_v45, 4  ;;  %v314_v13 = vsel %vm311_vm3, %v45_v23, %v265_v59 }
  0xbe   :  { %v744_v44 = vunpack.i.l.bf16 %v743_v43  ;;  %v124_v49 = vsel %vm121_vm1, %v685_v24, %v750_v41  ;;  %v739_v24 = vunpack.i.l.bf16 %v738_v27  ;;  %v745_v6 = vunpack.i.h.bf16 %v743_v43  ;;  %v48_v41 = vld [vmem:[#allocation2 + $0x18] sm:$0xf] }
  0xbf   :  { %v758_v51 = vpop.permute.xlu1 %757  ;;  %v277_v61 = vrot.slane %v124_v49, 4  ;;  %v315_v8 = vsel %vm311_vm3, %v938_v1, %v266_v58  ;;  %v82_v27 = vsel %vm67_vm0, %v734_v34, %v735_v2  ;;  %v710_v34 = vunpack.i.h.bf16 %v1022_v52 }
  0xc0   :  { %v760_v53 = vunpack.i.h.bf16 %v758_v51  ;;  %v133_v56 = vsel %vm121_vm1, %v670_v47, %v744_v44  ;;  %v759_v14 = vunpack.i.l.bf16 %v758_v51  ;;  %v83_v25 = vsel %vm67_vm0, %v735_v2, %v739_v24 }
  0xc1   :  { %v753_v55 = vpop.permute.xlu0 %752  ;;  %v278_v21 = vrot.slane %v133_v56, 4  ;;  %v135_v1 = vsel %vm121_vm1, %v745_v6, %v749_v4  ;;  %v134_v29 = vsel %vm121_vm1, %v744_v44, %v745_v6  ;;  %v268_v33 = vrot.slane %v83_v25, 4 }
  0xc2   :  { %v754_v63 = vunpack.i.l.bf16 %v753_v55  ;;  %v95_v17 = vsel %vm92_vm2, %v690_v35, %v760_v53  ;;  %v755_v19 = vunpack.i.h.bf16 %v753_v55  ;;  %v280_v36 = vrot.slane %v135_v1, 4 }
  0xc3   :  { %v1076_v18 = vpop.permute.xlu1 %244  ;;  %v320_v3 = vsel %vm311_vm3, %v95_v17, %v277_v61  ;;  %v267_v37 = vrot.slane %v82_v27, 4  ;;  %v279_v43 = vrot.slane %v134_v29, 4  ;;  %v705_v44 = vunpack.i.h.bf16 %v1024_v54 }
  0xc4   :  { %v107_v28 = vsel %vm92_vm2, %v675_v16, %v754_v63  ;;  %v629_v22 = vpack.c.bf16 %v320_v3, %v314_v13  ;;  %v109_v30 = vsel %vm92_vm2, %v755_v19, %v759_v14  ;;  %v108_v39 = vsel %vm92_vm2, %v754_v63, %v755_v19 }
  0xc5   :  { %v243_v7 = vpop.permute.xlu0 %242  ;;  %v321_v32 = vsel %vm311_vm3, %v107_v28, %v278_v21  ;;  %v323_v48 = vsel %vm311_vm3, %v109_v30, %v280_v36  ;;  %v725_v51 = vunpack.i.h.bf16 %v1053_v11  ;;  %v317_v53 = vsel %vm311_vm3, %v48_v41, %v268_v33 }
  0xc6   :  { %v250_v35 = vsel %vm248_vm8, %v243_v7, %v1076_v18  ;;  %v627_v10 = vpack.c.bf16 %v321_v32, %v315_v8  ;;  %v322_v16 = vsel %vm311_vm3, %v108_v39, %v279_v43  ;;  %v635_v59 = vpack.c.bf16 %v323_v48, %v317_v53 }
  0xc7   :  { %v1086_v20 = vpop.permute.xlu1 %767  ;;  %610 = vmatprep.subr.msk.mxu0 %vm311_vm3, %v250_v35  ;;  %v316_v61 = vsel %vm311_vm3, %v954_v9, %v267_v37  ;;  %v730_v11 = vunpack.i.h.bf16 %v1045_v5 }
  0xc8   :  { %628 = vmatprep.subr.bf16.mxu1 %v627_v10  ;;  %v770_v55 = vunpack.i.h.bf16 %v1086_v20  ;;  %v769_v21 = vunpack.i.l.bf16 %v1086_v20  ;;  %v637_v2 = vpack.c.bf16 %v322_v16, %v316_v61 }
  0xc9   :  { %v1091_v26 = vpop.permute.xlu0 %762  ;;  %630 = vmatpush1.bf16.msra.mxu1 %v629_v22 }
  0xca   :  { %v764_v45 = vunpack.i.l.bf16 %v1091_v26  ;;  %v765_v23 = vunpack.i.h.bf16 %v1091_v26  ;;  %v176_v5 = vsel %vm173_vm5, %v695_v50, %v770_v55 }
  0xcb   :  { %v778_v31 = vpop.permute.xlu1 %777  ;;  %v289_v26 = vrot.slane %v176_v5, 4 }
  0xcc   :  { %v185_v52 = vsel %vm173_vm5, %v705_v44, %v764_v45  ;;  %v780_v28 = vunpack.i.h.bf16 %v778_v31  ;;  %v779_v3 = vunpack.i.l.bf16 %v778_v31  ;;  %v187_v50 = vsel %vm173_vm5, %v765_v23, %v769_v21 }
  0xcd   :  { %v773_v40 = vpop.permute.xlu0 %772  ;;  %v290_v6 = vrot.slane %v185_v52, 4  ;;  %v186_v27 = vsel %vm173_vm5, %v764_v45, %v765_v23 }
  0xce   :  { %v774_v47 = vunpack.i.l.bf16 %v773_v40  ;;  %v775_v63 = vunpack.i.h.bf16 %v773_v40  ;;  %v228_v25 = vsel %vm225_vm4, %v700_v46, %v780_v28  ;;  %v292_v46 = vrot.slane %v187_v50, 4 }
  0xcf   :  { %v783_v49 = vpop.permute.xlu1 %782  ;;  %v301_v39 = vrot.slane %v228_v25, 4  ;;  %v291_v45 = vrot.slane %v186_v27, 4 }
  0xd0   :  { %v784_v56 = vunpack.i.l.bf16 %v783_v49  ;;  %v237_v17 = vsel %vm225_vm4, %v710_v34, %v774_v47  ;;  %v238_v35 = vsel %vm225_vm4, %v774_v47, %v775_v63  ;;  %v785_v19 = vunpack.i.h.bf16 %v783_v49 }
  0xd1   :  { %v241_v58 = vpop.permute.xlu0 %240  ;;  %v303_v29 = vrot.slane %v238_v35, 4 }
  0xd2   :  { %v249_v54 = vsel %vm248_vm8, %v241_v58, %v243_v7  ;;  %v159_v9 = vsel %vm144_vm7, %v725_v51, %v784_v56  ;;  %v302_v7 = vrot.slane %v237_v17, 4  ;;  %v160_v41 = vsel %vm144_vm7, %v784_v56, %v785_v19 }
  0xd3   :  { %v793_v24 = vpop.permute.xlu1 %792  ;;  %611 = vmatpush1.msk.msra.mxu0 %vm311_vm3, %v249_v54  ;;  %v327_v22 = vsel %vm311_vm3, %v159_v9, %v290_v6  ;;  %v328_v55 = vsel %vm311_vm3, %v160_v41, %v291_v45 }
  0xd4   :  { %v794_v4 = vunpack.i.l.bf16 %v793_v24  ;;  %636 = vmatprep.subr.bf16.mxu0 %v635_v59  ;;  %612 = vmatmul.mubr.msk.f32.vlgmr.msra.gmra.mrb[0].mxu0 %vm336_vm9, %v970_v15  ;;  %v795_v8 = vunpack.i.h.bf16 %v793_v24 }
  0xd5   :  { %v788_v32 = vpop.permute.xlu0 %787  ;;  %638 = vmatpush1.bf16.msra.mxu0 %v637_v2  ;;  %557 = vmatprep.mubr.f32.mxu0 %v891_v12  ;;  %v239_v12 = vsel %vm225_vm4, %v775_v63, %v779_v3 }
  0xd6   :  { %v211_v10 = vsel %vm196_vm6, %v730_v11, %v794_v4  ;;  %v790_v13 = vunpack.i.h.bf16 %v788_v32  ;;  %v789_v14 = vunpack.i.l.bf16 %v788_v32  ;;  %v212_v30 = vsel %vm196_vm6, %v794_v4, %v795_v8 }
  0xd7   :  { %v253_v20 = vpop.permute.xlu1 %252  ;;  %v333_v42 = vsel %vm311_vm3, %v211_v10, %v302_v7  ;;  %v304_v40 = vrot.slane %v239_v12, 4 }
  0xd8   :  { %v631_v1 = vpack.c.bf16 %v333_v42, %v327_v22  ;;  %v147_v33 = vsel %vm144_vm7, %v715_v0, %v790_v13  ;;  %v161_v36 = vsel %vm144_vm7, %v785_v19, %v789_v14  ;;  %v334_v0 = vsel %vm311_vm3, %v212_v30, %v303_v29 }
  0xd9   :  { %v798_v31 = vpop.permute.xlu0 %797  ;;  %v326_v34 = vsel %vm311_vm3, %v147_v33, %v289_v26  ;;  %v329_v44 = vsel %vm311_vm3, %v161_v36, %v292_v46  ;;  %v641_v57 = vpack.c.bf16 %v334_v0, %v328_v55 }
  0xda   :  { %v800_v37 = vunpack.i.h.bf16 %v798_v31  ;;  %v799_v38 = vunpack.i.l.bf16 %v798_v31  ;;  %632 = vmatprep.subr.bf16.mxu1 %v631_v1 }
  0xdb   :  { %v257_v43 = vpop.permute.xlu1 %256 }
  0xdc   :  { %v199_v47 = vsel %vm196_vm6, %v720_v60, %v800_v37  ;;  %v213_v62 = vsel %vm196_vm6, %v795_v8, %v799_v38 }
  0xdd   :  { %v255_v48 = vpop.permute.xlu0 %254  ;;  %v332_v49 = vsel %vm311_vm3, %v199_v47, %v301_v39  ;;  %v335_v51 = vsel %vm311_vm3, %v213_v62, %v304_v40 }
  0xde   :  { %v633_v53 = vpack.c.bf16 %v332_v49, %v326_v34  ;;  %v639_v16 = vpack.c.bf16 %v335_v51, %v329_v44  ;;  %v260_v60 = vsel %vm248_vm8, %v253_v20, %v255_v48  ;;  %v261_v52 = vsel %vm248_vm8, %v255_v48, %v257_v43 }
  0xdf   :  { %v247_v56 = vpop.permute.xlu1 %246 }
  0xe0   :  { %634 = vmatpush1.bf16.msra.mxu1 %v633_v53  ;;  %640 = vmatprep.subr.bf16.mxu0 %v639_v16  ;;  %v251_v61 = vsel %vm248_vm8, %v1076_v18, %v247_v56 }
  0xe1   :  { %v259_v58 = vpop.permute.xlu0 %258  ;;  %613 = vmatprep.subr.msk.mxu1 %vm311_vm3, %v260_v60  ;;  %642 = vmatpush1.bf16.msra.mxu0 %v641_v57 }
  0xe2   :  { %v262_v59 = vsel %vm248_vm8, %v257_v43, %v259_v58 }
  0xe3   :  { %616 = vmatprep.subr.msk.mxu0 %vm311_vm3, %v262_v59 }
  0xe4   :  { %614 = vmatpush1.msk.msra.mxu1 %vm311_vm3, %v251_v61 }
  0xe5   :  { %615 = vmatmul.mubr.msk.f32.vlgmr.msra.gmra.mrb[0].mxu1 %vm336_vm9, %v970_v15  ;;  %617 = vmatpush1.msk.msra.mxu0 %vm311_vm3, %v261_v52  ;;  %v41_v63 = vpop.permute.xlu0 %40 }
  0xe6   :  { %618 = vmatmul.mubr.msk.f32.vlgmr.msra.gmra.mrb[2].mxu0 %vm336_vm9, %v970_v15  ;;  %v43_v17 = vmul.f32 %v41_v63, %v970_v15 }
  0xe8   :  { %576 = vperm.xlu0 %802, %v43_v17  }
  0xf0   :  { %v566_v54 = vpop.permute.xlu1 %565 }
 0x167   :  { %v577_v11 = vpop.permute.xlu0 %576 }
 0x1a7   :  { %v417_v18 = vpop.f32.mrb[0].mxu0 }
 0x1a8   :  { %v568_v21 = vmul.f32 %v566_v54, %v417_v18  ;;  %v419_v23 = vpop.f32.mrb[1].mxu0 }
 0x1a9   :  { %v569_v24 = vmul.f32 %v566_v54, %v419_v23 }
 0x1aa   :  { %v579_v2 = vadd.f32 %v577_v11, %v568_v21 }
 0x1ab   :  { %v580_v28 = vadd.f32 %v577_v11, %v569_v24 }
 0x1ac   :  { %585 = vst [vmem:[#allocation7] sm:$0xff] %v579_v2 }
 0x1ad   :  { %586 = vst [vmem:[#allocation7 + $0x8] sm:$0xff] %v580_v28 }
 0x1b8   :  { %v488_v3 = vpop.f32.mrb[0].mxu1 }
 0x1b9   :  { %v570_v9 = vmul.f32 %v566_v54, %v488_v3  ;;  %v490_v4 = vpop.f32.mrb[1].mxu1  ;;  %v559_v5 = vpop.f32.mrb[2].mxu0 }
 0x1ba   :  { %v571_v6 = vmul.f32 %v566_v54, %v490_v4  ;;  %v572_v7 = vmul.f32 %v566_v54, %v559_v5  ;;  %v561_v8 = vpop.f32.mrb[3].mxu0 }
 0x1bb   :  { %v581_v15 = vadd.f32 %v577_v11, %v570_v9  ;;  %v573_v32 = vmul.f32 %v566_v54, %v561_v8 }
 0x1bc   :  { %v582_v35 = vadd.f32 %v577_v11, %v571_v6  ;;  %v583_v10 = vadd.f32 %v577_v11, %v572_v7 }
 0x1bd   :  { %587 = vst [vmem:[#allocation7 + $0x10] sm:$0xff] %v581_v15  ;;  %v584_v13 = vadd.f32 %v577_v11, %v573_v32 }
 0x1be   :  { %589 = vst [vmem:[#allocation7 + $0x18] sm:$0xff] %v582_v35  ;;  %590 = vst [vmem:[#allocation7 + $0x20] sm:$0xff] %v583_v10 }
 0x1bf   :  { %591 = vst [vmem:[#allocation7 + $0x28] sm:$0xff] %v584_v13 }
 0x1c0   :  { %862 = shalt.err (!%p859_p6)
}
 0x1c1   :  { %s863_s18 = scalar_lea.hbm %s1175_s2, 768 }
 0x1c2   :  { %p864_p7 = scmp.ne.s32.totalorder %s1175_s2, %s863_s18  ;;  %p867_p8 = scmp.lt.u32.totalorder %s863_s18, %s1175_s2 }
 0x1c4   :  { %p869_p9 = pnand %p867_p8, %p864_p7 }
 0x1c6   :  { %872 = shalt.err (!%p869_p9)
}
 0x1c7   :  { %s895_s23 = smov 384   ;;  %s896_s24 = smov 24  }
 0x1c8   :  { %603 = dma.vmem_to_hbm [thread:$0]  %s598_s14, 768, %s1175_s2, [#allocation4], %s895_s23, %s895_s23, %s896_s24  }
 0x1c9   :  { %877 = dma.done.wait [#allocation4], 768  }
 0x1ca   :  { %878 = vsyncadd [#allocation4], 4294966528 }
 0x1cb   :  { %607 = vsyncpa [#allocation3], 1 }
 0x1cc   :  { %608 = vsyncpa [#allocation6], 1 }
 0x1cd   :  { %609 = vsyncpa [#allocation4], 1 }

</bundles_post_ra>
